<compile_context>
chip_gen: v5e
topology: v5e:2x2
jax: 0.10.0
libtpu: 0.0.40
codegen_flags: <defaults>
</compile_context>

<pallas_src>
import math
import functools

import jax
import jax.numpy as jnp
from jax.experimental import pallas as pl
from jax.experimental.pallas import tpu as pltpu


# ---------------------------------------------------------------------------
# Kernel 1: fused Linear + ReLU projections for drug AND protein.
#   drug block   : (1, F, d_il)   original (features, length) layout
#   protein block: (1, F, p_il)
#   Wd, Wp       : (F, head*F)    weights stored transposed (x @ W form);
#                                 Wd/bd are pre-scaled by 1/sqrt(F).
#   outputs      : (1, d_il, head*F) and (1, p_il, head*F)
# The permute(0,2,1) of the PyTorch code is realized by contracting dim 0 of
# the (F, L) block with dim 0 of the weight (transposed-LHS matmul on MXU).
# ---------------------------------------------------------------------------
def _proj_kernel(drug_ref, prot_ref, wd_ref, bd_ref, wp_ref, bp_ref,
                 dproj_ref, pproj_ref):
    d = drug_ref[0]                       # (F, d_il)
    p = prot_ref[0]                       # (F, p_il)
    yd = jax.lax.dot_general(             # drug^T @ Wd  -> (d_il, HF)
        d, wd_ref[...], (((0,), (0,)), ((), ())),
        preferred_element_type=jnp.float32)
    yp = jax.lax.dot_general(             # protein^T @ Wp -> (p_il, HF)
        p, wp_ref[...], (((0,), (0,)), ((), ())),
        preferred_element_type=jnp.float32)
    dproj_ref[0] = jnp.maximum(yd + bd_ref[...], 0.0)
    pproj_ref[0] = jnp.maximum(yp + bp_ref[...], 0.0)


def project_both(drug, protein, Wd, bd, Wp, bp):
    """drug:(B,F,d_il), protein:(B,F,p_il) -> ((B,d_il,HF), (B,p_il,HF))."""
    bsz, F, d_il = drug.shape
    _, _, p_il = protein.shape
    HF = Wd.shape[1]
    bd2 = bd.reshape(1, HF)
    bp2 = bp.reshape(1, HF)
    return pl.pallas_call(
        _proj_kernel,
        out_shape=(
            jax.ShapeDtypeStruct((bsz, d_il, HF), jnp.float32),
            jax.ShapeDtypeStruct((bsz, p_il, HF), jnp.float32),
        ),
        grid=(bsz,),
        in_specs=[
            pl.BlockSpec((1, F, d_il), lambda i: (i, 0, 0)),
            pl.BlockSpec((1, F, p_il), lambda i: (i, 0, 0)),
            pl.BlockSpec((F, HF), lambda i: (0, 0)),
            pl.BlockSpec((1, HF), lambda i: (0, 0)),
            pl.BlockSpec((F, HF), lambda i: (0, 0)),
            pl.BlockSpec((1, HF), lambda i: (0, 0)),
        ],
        out_specs=(
            pl.BlockSpec((1, d_il, HF), lambda i: (i, 0, 0)),
            pl.BlockSpec((1, p_il, HF), lambda i: (i, 0, 0)),
        ),
        compiler_params=pltpu.CompilerParams(dimension_semantics=("parallel",)),
    )(drug, protein, Wd, bd2, Wp, bp2)


# ---------------------------------------------------------------------------
# Kernel 2: per-head interaction map + attention weights + rescale.
#   drug_att    : (1, head, d_il, F)   (already 1/scale-scaled via the weights)
#   protein_att : (1, head, p_il, F)
#   drug        : (1, F, d_il)         original input
#   protein     : (1, F, p_il)
# Computes (per batch element):
#   acc   = sum_h tanh( drug_att[h] @ protein_att[h]^T )      (d_il, p_il)
#   prot  = tanh( (1/head) * sum_i acc[i, :] )                 (1, p_il)
#   comp  = tanh( (1/head) * sum_j acc[:, j] )   as (1, d_il) via ones @ acc^T
#   dout  = drug * comp ; pout = protein * prot
# Only ONE matmul + ONE tanh per head (no transposed duplicate path).
# ---------------------------------------------------------------------------
def _make_attn_kernel(head):
    inv_head = 1.0 / float(head)

    def attn_kernel(datt_ref, patt_ref, drug_ref, prot_ref, dout_ref, pout_ref):
        d_il = datt_ref.shape[2]
        p_il = patt_ref.shape[2]
        acc = jnp.zeros((d_il, p_il), jnp.float32)
        for h in range(head):                       # static unrolled (head small)
            dh = datt_ref[0, h]                     # (d_il, F)
            ph = patt_ref[0, h]                     # (p_il, F)
            s = jax.lax.dot_general(                # dh @ ph^T -> (d_il, p_il)
                dh, ph, (((1,), (1,)), ((), ())),
                preferred_element_type=jnp.float32)
            acc = acc + jnp.tanh(s)

        # protein attention: column sums of im = acc/head  -> (1, p_il)
        prot_row = jnp.tanh(inv_head * jnp.sum(acc, axis=0, keepdims=True))

        # drug attention: row sums of im presented lane-major as (1, d_il)
        # via a tiny MXU contraction (avoids an explicit transpose).
        ones_row = jnp.ones((1, p_il), jnp.float32)
        row_sums = jax.lax.dot_general(             # (1, d_il)
            ones_row, acc, (((1,), (1,)), ((), ())),
            preferred_element_type=jnp.float32)
        comp_row = jnp.tanh(inv_head * row_sums)

        dout_ref[0] = drug_ref[0] * comp_row        # (F, d_il) * (1, d_il)
        pout_ref[0] = prot_ref[0] * prot_row        # (F, p_il) * (1, p_il)

    return attn_kernel


def attention_core(drug_att, protein_att, drug, protein, head):
    bsz, _, d_il, F = drug_att.shape
    _, _, p_il, _ = protein_att.shape
    d_ef = drug.shape[1]
    p_ef = protein.shape[1]
    kern = _make_attn_kernel(head)
    return pl.pallas_call(
        kern,
        out_shape=(
            jax.ShapeDtypeStruct((bsz, d_ef, d_il), jnp.float32),
            jax.ShapeDtypeStruct((bsz, p_ef, p_il), jnp.float32),
        ),
        grid=(bsz,),
        in_specs=[
            pl.BlockSpec((1, head, d_il, F), lambda i: (i, 0, 0, 0)),
            pl.BlockSpec((1, head, p_il, F), lambda i: (i, 0, 0, 0)),
            pl.BlockSpec((1, d_ef, d_il), lambda i: (i, 0, 0)),
            pl.BlockSpec((1, p_ef, p_il), lambda i: (i, 0, 0)),
        ],
        out_specs=(
            pl.BlockSpec((1, d_ef, d_il), lambda i: (i, 0, 0)),
            pl.BlockSpec((1, p_ef, p_il), lambda i: (i, 0, 0)),
        ),
        compiler_params=pltpu.CompilerParams(dimension_semantics=("parallel",)),
    )(drug_att, protein_att, drug, protein)


# ---------------------------------------------------------------------------
# Full forward (mirrors attention.forward)
# ---------------------------------------------------------------------------
@functools.partial(jax.jit, static_argnames=("head",))
def attention_forward(drug, protein, Wd, bd, Wp, bp, *, head):
    bsz, d_ef, d_il = drug.shape
    _, p_ef, p_il = protein.shape
    F = d_ef                                   # = conv * 3
    inv_scale = 1.0 / math.sqrt(float(F))      # torch.sqrt(FloatTensor([conv*3]))

    # Fold 1/scale into the drug projection (ReLU is positively homogeneous),
    # so no per-head divide of the (d_il, p_il) scores is needed in-kernel.
    Wd_s = Wd * inv_scale
    bd_s = bd * inv_scale

    # Fused Linear + ReLU for both inputs (permute folded into the matmul).
    d_proj, p_proj = project_both(drug, protein, Wd_s, bd_s, Wp, bp)

    # torch .view(bsz, head, L, F) on the contiguous (B, L, head*F) buffer:
    # identical to a row-major reshape (wrapper glue, see TODO at top).
    drug_att = d_proj.reshape(bsz, head, d_il, F)
    protein_att = p_proj.reshape(bsz, head, p_il, F)

    return attention_core(drug_att, protein_att, drug, protein, head)


# ---------------------------------------------------------------------------
# Pure-JAX reference (for correctness check)
# ---------------------------------------------------------------------------
def reference(drug, protein, Wd, bd, Wp, bp, head):
    bsz, d_ef, d_il = drug.shape
    _, p_ef, p_il = protein.shape
    F = d_ef
    scale = jnp.sqrt(jnp.float32(F))
    da = jax.nn.relu(
        jnp.einsum('bfl,fo->blo', drug, Wd, precision='highest') + bd
    ).reshape(bsz, head, d_il, F)
    pa = jax.nn.relu(
        jnp.einsum('bfl,fo->blo', protein, Wp, precision='highest') + bp
    ).reshape(bsz, head, p_il, F)
    im = jnp.mean(
        jnp.tanh(jnp.einsum('bhid,bhjd->bhij', da, pa, precision='highest') / scale),
        axis=1)
    comp = jnp.tanh(jnp.sum(im, axis=2))[:, None, :]
    prot = jnp.tanh(jnp.sum(im, axis=1))[:, None, :]
    return drug * comp, protein * prot


if __name__ == "__main__":
    # Small, module-consistent shapes: feature dim = conv * 3
    head = 2
    conv = 8
    F = conv * 3          # 24
    bsz, d_il, p_il = 2, 16, 12

    key = jax.random.PRNGKey(0)
    k1, k2, k3, k4, k5, k6 = jax.random.split(key, 6)
    drug = jax.random.normal(k1, (bsz, F, d_il), dtype=jnp.float32)
    protein = jax.random.normal(k2, (bsz, F, p_il), dtype=jnp.float32)
    # Linear(F, head*F): store weight transposed as (F, head*F)
    Wd = 0.1 * jax.random.normal(k3, (F, head * F), dtype=jnp.float32)
    bd = 0.1 * jax.random.normal(k4, (head * F,), dtype=jnp.float32)
    Wp = 0.1 * jax.random.normal(k5, (F, head * F), dtype=jnp.float32)
    bp = 0.1 * jax.random.normal(k6, (head * F,), dtype=jnp.float32)

    drug_out, protein_out = attention_forward(
        drug, protein, Wd, bd, Wp, bp, head=head)
    jax.block_until_ready((drug_out, protein_out))

    d_ref, p_ref = reference(drug, protein, Wd, bd, Wp, bp, head)
    assert drug_out.shape == (bsz, F, d_il) and protein_out.shape == (bsz, F, p_il)
    assert jnp.allclose(drug_out, d_ref, atol=1e-3, rtol=1e-3)
    assert jnp.allclose(protein_out, p_ref, atol=1e-3, rtol=1e-3)

    print("KERNEL_OK")
</pallas_src>

<mosaic_0001>
module attributes {stable_mosaic.version = 11 : i64} {
  func.func @_proj_kernel(%arg0: i32, %arg1: memref<1x24x16xf32, #tpu.memory_space<vmem>>, %arg2: memref<1x24x12xf32, #tpu.memory_space<vmem>>, %arg3: memref<24x48xf32, #tpu.memory_space<vmem>>, %arg4: memref<1x48xf32, #tpu.memory_space<vmem>>, %arg5: memref<24x48xf32, #tpu.memory_space<vmem>>, %arg6: memref<1x48xf32, #tpu.memory_space<vmem>>, %arg7: memref<1x16x48xf32, #tpu.memory_space<vmem>>, %arg8: memref<1x12x48xf32, #tpu.memory_space<vmem>>) attributes {dimension_semantics = [#tpu.dimension_semantics<parallel>], iteration_bounds = array<i64: 2>, scalar_prefetch = 0 : i64, scratch_operands = 0 : i64, tpu.core_type = #tpu.core_type<tc>, window_params = [{transform_indices = @transform_0, window_bounds = array<i64: 1, 24, 16>}, {transform_indices = @transform_1, window_bounds = array<i64: 1, 24, 12>}, {pipeline_mode = #tpu.pipeline_mode<synchronous>, transform_indices = @transform_2, window_bounds = array<i64: 24, 48>}, {pipeline_mode = #tpu.pipeline_mode<synchronous>, transform_indices = @transform_3, window_bounds = array<i64: 1, 48>}, {pipeline_mode = #tpu.pipeline_mode<synchronous>, transform_indices = @transform_4, window_bounds = array<i64: 24, 48>}, {pipeline_mode = #tpu.pipeline_mode<synchronous>, transform_indices = @transform_5, window_bounds = array<i64: 1, 48>}, {transform_indices = @transform_6, window_bounds = array<i64: 1, 16, 48>}, {transform_indices = @transform_7, window_bounds = array<i64: 1, 12, 48>}]} {
    %c0 = arith.constant 0 : index
    %c0_0 = arith.constant 0 : index
    %c0_1 = arith.constant 0 : index
    %0 = vector.load %arg1[%c0, %c0_0, %c0_1] : memref<1x24x16xf32, #tpu.memory_space<vmem>>, vector<1x24x16xf32>
    %1 = vector.shape_cast %0 : vector<1x24x16xf32> to vector<24x16xf32>
    %c0_2 = arith.constant 0 : index
    %c0_3 = arith.constant 0 : index
    %c0_4 = arith.constant 0 : index
    %2 = vector.load %arg2[%c0_2, %c0_3, %c0_4] : memref<1x24x12xf32, #tpu.memory_space<vmem>>, vector<1x24x12xf32>
    %3 = vector.shape_cast %2 : vector<1x24x12xf32> to vector<24x12xf32>
    %c0_5 = arith.constant 0 : index
    %c0_6 = arith.constant 0 : index
    %4 = vector.load %arg3[%c0_5, %c0_6] : memref<24x48xf32, #tpu.memory_space<vmem>>, vector<24x48xf32>
    %cst = arith.constant dense<0.000000e+00> : vector<16x48xf32>
    %5 = tpu.matmul %1, %4, %cst {dimension_numbers = #tpu.dot_dimension_numbers<[0], [0], [1], [1], [0, 1, 1, 1], [], []>} : vector<24x16xf32>, vector<24x48xf32>, vector<16x48xf32> -> vector<16x48xf32>
    %c0_7 = arith.constant 0 : index
    %c0_8 = arith.constant 0 : index
    %6 = vector.load %arg5[%c0_7, %c0_8] : memref<24x48xf32, #tpu.memory_space<vmem>>, vector<24x48xf32>
    %cst_9 = arith.constant dense<0.000000e+00> : vector<12x48xf32>
    %7 = tpu.matmul %3, %6, %cst_9 {dimension_numbers = #tpu.dot_dimension_numbers<[0], [0], [1], [1], [0, 1, 1, 1], [], []>} : vector<24x12xf32>, vector<24x48xf32>, vector<12x48xf32> -> vector<12x48xf32>
    %c0_10 = arith.constant 0 : index
    %c0_11 = arith.constant 0 : index
    %8 = vector.load %arg4[%c0_10, %c0_11] : memref<1x48xf32, #tpu.memory_space<vmem>>, vector<1x48xf32>
    %9 = vector.broadcast %8 : vector<1x48xf32> to vector<16x48xf32>
    %10 = arith.addf %5, %9 : vector<16x48xf32>
    %cst_12 = arith.constant 0.000000e+00 : f32
    %11 = vector.broadcast %cst_12 : f32 to vector<16x48xf32>
    %12 = arith.maximumf %10, %11 : vector<16x48xf32>
    %c0_13 = arith.constant 0 : index
    %c0_14 = arith.constant 0 : index
    %c0_15 = arith.constant 0 : index
    %13 = vector.load %arg7[%c0_13, %c0_14, %c0_15] : memref<1x16x48xf32, #tpu.memory_space<vmem>>, vector<1x16x48xf32>
    %14 = vector.shape_cast %13 : vector<1x16x48xf32> to vector<16x48xf32>
    %15 = vector.shape_cast %12 : vector<16x48xf32> to vector<1x16x48xf32>
    tpu.vector_store %arg7[%c0_13, %c0_14, %c0_15], %15 {strides = array<i32>} : memref<1x16x48xf32, #tpu.memory_space<vmem>>, vector<1x16x48xf32>,
    %c0_16 = arith.constant 0 : index
    %c0_17 = arith.constant 0 : index
    %16 = vector.load %arg6[%c0_16, %c0_17] : memref<1x48xf32, #tpu.memory_space<vmem>>, vector<1x48xf32>
    %17 = vector.broadcast %16 : vector<1x48xf32> to vector<12x48xf32>
    %18 = arith.addf %7, %17 : vector<12x48xf32>
    %cst_18 = arith.constant 0.000000e+00 : f32
    %19 = vector.broadcast %cst_18 : f32 to vector<12x48xf32>
    %20 = arith.maximumf %18, %19 : vector<12x48xf32>
    %c0_19 = arith.constant 0 : index
    %c0_20 = arith.constant 0 : index
    %c0_21 = arith.constant 0 : index
    %21 = vector.load %arg8[%c0_19, %c0_20, %c0_21] : memref<1x12x48xf32, #tpu.memory_space<vmem>>, vector<1x12x48xf32>
    %22 = vector.shape_cast %21 : vector<1x12x48xf32> to vector<12x48xf32>
    %23 = vector.shape_cast %20 : vector<12x48xf32> to vector<1x12x48xf32>
    tpu.vector_store %arg8[%c0_19, %c0_20, %c0_21], %23 {strides = array<i32>} : memref<1x12x48xf32, #tpu.memory_space<vmem>>, vector<1x12x48xf32>,
    return
  }
  func.func @transform_0(%arg0: i32) -> (i32, i32, i32) {
    %c0_i32 = arith.constant 0 : i32
    %c0_i32_0 = arith.constant 0 : i32
    %c0_i32_1 = arith.constant 0 : i32
    return %arg0, %c0_i32, %c0_i32_0 : i32, i32, i32
  }
  func.func @transform_1(%arg0: i32) -> (i32, i32, i32) {
    %c0_i32 = arith.constant 0 : i32
    %c0_i32_0 = arith.constant 0 : i32
    %c0_i32_1 = arith.constant 0 : i32
    return %arg0, %c0_i32, %c0_i32_0 : i32, i32, i32
  }
  func.func @transform_2(%arg0: i32) -> (i32, i32) {
    %c0_i32 = arith.constant 0 : i32
    %c0_i32_0 = arith.constant 0 : i32
    %c0_i32_1 = arith.constant 0 : i32
    return %c0_i32, %c0_i32_0 : i32, i32
  }
  func.func @transform_3(%arg0: i32) -> (i32, i32) {
    %c0_i32 = arith.constant 0 : i32
    %c0_i32_0 = arith.constant 0 : i32
    %c0_i32_1 = arith.constant 0 : i32
    return %c0_i32, %c0_i32_0 : i32, i32
  }
  func.func @transform_4(%arg0: i32) -> (i32, i32) {
    %c0_i32 = arith.constant 0 : i32
    %c0_i32_0 = arith.constant 0 : i32
    %c0_i32_1 = arith.constant 0 : i32
    return %c0_i32, %c0_i32_0 : i32, i32
  }
  func.func @transform_5(%arg0: i32) -> (i32, i32) {
    %c0_i32 = arith.constant 0 : i32
    %c0_i32_0 = arith.constant 0 : i32
    %c0_i32_1 = arith.constant 0 : i32
    return %c0_i32, %c0_i32_0 : i32, i32
  }
  func.func @transform_6(%arg0: i32) -> (i32, i32, i32) {
    %c0_i32 = arith.constant 0 : i32
    %c0_i32_0 = arith.constant 0 : i32
    %c0_i32_1 = arith.constant 0 : i32
    return %arg0, %c0_i32, %c0_i32_0 : i32, i32, i32
  }
  func.func @transform_7(%arg0: i32) -> (i32, i32, i32) {
    %c0_i32 = arith.constant 0 : i32
    %c0_i32_0 = arith.constant 0 : i32
    %c0_i32_1 = arith.constant 0 : i32
    return %arg0, %c0_i32, %c0_i32_0 : i32, i32, i32
  }
}

module attributes {stable_mosaic.version = 11 : i64} {
  func.func @attn_kernel(%arg0: i32, %arg1: memref<1x2x16x24xf32, #tpu.memory_space<vmem>>, %arg2: memref<1x2x12x24xf32, #tpu.memory_space<vmem>>, %arg3: memref<1x24x16xf32, #tpu.memory_space<vmem>>, %arg4: memref<1x24x12xf32, #tpu.memory_space<vmem>>, %arg5: memref<1x24x16xf32, #tpu.memory_space<vmem>>, %arg6: memref<1x24x12xf32, #tpu.memory_space<vmem>>) attributes {dimension_semantics = [#tpu.dimension_semantics<parallel>], iteration_bounds = array<i64: 2>, scalar_prefetch = 0 : i64, scratch_operands = 0 : i64, tpu.core_type = #tpu.core_type<tc>, window_params = [{transform_indices = @transform_0, window_bounds = array<i64: 1, 2, 16, 24>}, {transform_indices = @transform_1, window_bounds = array<i64: 1, 2, 12, 24>}, {transform_indices = @transform_2, window_bounds = array<i64: 1, 24, 16>}, {transform_indices = @transform_3, window_bounds = array<i64: 1, 24, 12>}, {transform_indices = @transform_4, window_bounds = array<i64: 1, 24, 16>}, {transform_indices = @transform_5, window_bounds = array<i64: 1, 24, 12>}]} {
    %cst = arith.constant 0.000000e+00 : f32
    %0 = vector.broadcast %cst : f32 to vector<16x12xf32>
    %c0 = arith.constant 0 : index
    %c0_0 = arith.constant 0 : index
    %c0_1 = arith.constant 0 : index
    %c0_2 = arith.constant 0 : index
    %1 = vector.load %arg1[%c0, %c0_0, %c0_1, %c0_2] : memref<1x2x16x24xf32, #tpu.memory_space<vmem>>, vector<1x1x16x24xf32>
    %2 = vector.shape_cast %1 : vector<1x1x16x24xf32> to vector<16x24xf32>
    %c0_3 = arith.constant 0 : index
    %c0_4 = arith.constant 0 : index
    %c0_5 = arith.constant 0 : index
    %c0_6 = arith.constant 0 : index
    %3 = vector.load %arg2[%c0_3, %c0_4, %c0_5, %c0_6] : memref<1x2x12x24xf32, #tpu.memory_space<vmem>>, vector<1x1x12x24xf32>
    %4 = vector.shape_cast %3 : vector<1x1x12x24xf32> to vector<12x24xf32>
    %cst_7 = arith.constant dense<0.000000e+00> : vector<16x12xf32>
    %5 = tpu.matmul %2, %4, %cst_7 {dimension_numbers = #tpu.dot_dimension_numbers<[1], [1], [0], [0], [0, 0, 1, 0], [], []>} : vector<16x24xf32>, vector<12x24xf32>, vector<16x12xf32> -> vector<16x12xf32>
    %6 = math.tanh %5 : vector<16x12xf32>
    %7 = arith.addf %0, %6 : vector<16x12xf32>
    %c0_8 = arith.constant 0 : index
    %c1 = arith.constant 1 : index
    %c0_9 = arith.constant 0 : index
    %c0_10 = arith.constant 0 : index
    %8 = vector.load %arg1[%c0_8, %c1, %c0_9, %c0_10] : memref<1x2x16x24xf32, #tpu.memory_space<vmem>>, vector<1x1x16x24xf32>
    %9 = vector.shape_cast %8 : vector<1x1x16x24xf32> to vector<16x24xf32>
    %c0_11 = arith.constant 0 : index
    %c1_12 = arith.constant 1 : index
    %c0_13 = arith.constant 0 : index
    %c0_14 = arith.constant 0 : index
    %10 = vector.load %arg2[%c0_11, %c1_12, %c0_13, %c0_14] : memref<1x2x12x24xf32, #tpu.memory_space<vmem>>, vector<1x1x12x24xf32>
    %11 = vector.shape_cast %10 : vector<1x1x12x24xf32> to vector<12x24xf32>
    %cst_15 = arith.constant dense<0.000000e+00> : vector<16x12xf32>
    %12 = tpu.matmul %9, %11, %cst_15 {dimension_numbers = #tpu.dot_dimension_numbers<[1], [1], [0], [0], [0, 0, 1, 0], [], []>} : vector<16x24xf32>, vector<12x24xf32>, vector<16x12xf32> -> vector<16x12xf32>
    %13 = math.tanh %12 : vector<16x12xf32>
    %14 = arith.addf %7, %13 : vector<16x12xf32>
    %cst_16 = arith.constant dense<0.000000e+00> : vector<12xf32>
    %15 = vector.multi_reduction <add>, %14, %cst_16 [0] : vector<16x12xf32> to vector<12xf32>
    %16 = vector.shape_cast %15 : vector<12xf32> to vector<1x12xf32>
    %cst_17 = arith.constant 5.000000e-01 : f32
    %17 = vector.broadcast %cst_17 : f32 to vector<1x12xf32>
    %18 = arith.mulf %17, %16 : vector<1x12xf32>
    %19 = math.tanh %18 : vector<1x12xf32>
    %cst_18 = arith.constant 1.000000e+00 : f32
    %20 = vector.broadcast %cst_18 : f32 to vector<1x12xf32>
    %cst_19 = arith.constant dense<0.000000e+00> : vector<1x16xf32>
    %21 = tpu.matmul %20, %14, %cst_19 {dimension_numbers = #tpu.dot_dimension_numbers<[1], [1], [0], [0], [0, 0, 1, 0], [], []>} : vector<1x12xf32>, vector<16x12xf32>, vector<1x16xf32> -> vector<1x16xf32>
    %cst_20 = arith.constant 5.000000e-01 : f32
    %22 = vector.broadcast %cst_20 : f32 to vector<1x16xf32>
    %23 = arith.mulf %22, %21 : vector<1x16xf32>
    %24 = math.tanh %23 : vector<1x16xf32>
    %c0_21 = arith.constant 0 : index
    %c0_22 = arith.constant 0 : index
    %c0_23 = arith.constant 0 : index
    %25 = vector.load %arg3[%c0_21, %c0_22, %c0_23] : memref<1x24x16xf32, #tpu.memory_space<vmem>>, vector<1x24x16xf32>
    %26 = vector.shape_cast %25 : vector<1x24x16xf32> to vector<24x16xf32>
    %27 = vector.broadcast %24 : vector<1x16xf32> to vector<24x16xf32>
    %28 = arith.mulf %26, %27 : vector<24x16xf32>
    %c0_24 = arith.constant 0 : index
    %c0_25 = arith.constant 0 : index
    %c0_26 = arith.constant 0 : index
    %29 = vector.load %arg5[%c0_24, %c0_25, %c0_26] : memref<1x24x16xf32, #tpu.memory_space<vmem>>, vector<1x24x16xf32>
    %30 = vector.shape_cast %29 : vector<1x24x16xf32> to vector<24x16xf32>
    %31 = vector.shape_cast %28 : vector<24x16xf32> to vector<1x24x16xf32>
    tpu.vector_store %arg5[%c0_24, %c0_25, %c0_26], %31 {strides = array<i32>} : memref<1x24x16xf32, #tpu.memory_space<vmem>>, vector<1x24x16xf32>,
    %c0_27 = arith.constant 0 : index
    %c0_28 = arith.constant 0 : index
    %c0_29 = arith.constant 0 : index
    %32 = vector.load %arg4[%c0_27, %c0_28, %c0_29] : memref<1x24x12xf32, #tpu.memory_space<vmem>>, vector<1x24x12xf32>
    %33 = vector.shape_cast %32 : vector<1x24x12xf32> to vector<24x12xf32>
    %34 = vector.broadcast %19 : vector<1x12xf32> to vector<24x12xf32>
    %35 = arith.mulf %33, %34 : vector<24x12xf32>
    %c0_30 = arith.constant 0 : index
    %c0_31 = arith.constant 0 : index
    %c0_32 = arith.constant 0 : index
    %36 = vector.load %arg6[%c0_30, %c0_31, %c0_32] : memref<1x24x12xf32, #tpu.memory_space<vmem>>, vector<1x24x12xf32>
    %37 = vector.shape_cast %36 : vector<1x24x12xf32> to vector<24x12xf32>
    %38 = vector.shape_cast %35 : vector<24x12xf32> to vector<1x24x12xf32>
    tpu.vector_store %arg6[%c0_30, %c0_31, %c0_32], %38 {strides = array<i32>} : memref<1x24x12xf32, #tpu.memory_space<vmem>>, vector<1x24x12xf32>,
    return
  }
  func.func @transform_0(%arg0: i32) -> (i32, i32, i32, i32) {
    %c0_i32 = arith.constant 0 : i32
    %c0_i32_0 = arith.constant 0 : i32
    %c0_i32_1 = arith.constant 0 : i32
    %c0_i32_2 = arith.constant 0 : i32
    return %arg0, %c0_i32, %c0_i32_0, %c0_i32_1 : i32, i32, i32, i32
  }
  func.func @transform_1(%arg0: i32) -> (i32, i32, i32, i32) {
    %c0_i32 = arith.constant 0 : i32
    %c0_i32_0 = arith.constant 0 : i32
    %c0_i32_1 = arith.constant 0 : i32
    %c0_i32_2 = arith.constant 0 : i32
    return %arg0, %c0_i32, %c0_i32_0, %c0_i32_1 : i32, i32, i32, i32
  }
  func.func @transform_2(%arg0: i32) -> (i32, i32, i32) {
    %c0_i32 = arith.constant 0 : i32
    %c0_i32_0 = arith.constant 0 : i32
    %c0_i32_1 = arith.constant 0 : i32
    return %arg0, %c0_i32, %c0_i32_0 : i32, i32, i32
  }
  func.func @transform_3(%arg0: i32) -> (i32, i32, i32) {
    %c0_i32 = arith.constant 0 : i32
    %c0_i32_0 = arith.constant 0 : i32
    %c0_i32_1 = arith.constant 0 : i32
    return %arg0, %c0_i32, %c0_i32_0 : i32, i32, i32
  }
  func.func @transform_4(%arg0: i32) -> (i32, i32, i32) {
    %c0_i32 = arith.constant 0 : i32
    %c0_i32_0 = arith.constant 0 : i32
    %c0_i32_1 = arith.constant 0 : i32
    return %arg0, %c0_i32, %c0_i32_0 : i32, i32, i32
  }
  func.func @transform_5(%arg0: i32) -> (i32, i32, i32) {
    %c0_i32 = arith.constant 0 : i32
    %c0_i32_0 = arith.constant 0 : i32
    %c0_i32_1 = arith.constant 0 : i32
    return %arg0, %c0_i32, %c0_i32_0 : i32, i32, i32
  }
}

</mosaic_0001>

<bundles_post_ra>
// kernel: attention_forward.3
= control target key start
LH: loop header
LB: loop body
LE: loop exit
PB: predicated region body
PF: predicated region fallthrough
CT: control target
= control target key end

     0   :  { %s669_s18 = smov 0   ;;  %s720_s0 = inlined_call_operand.vmem [shape: f32[2,2,16,24], index: 0, kind: input, shape index: {}]   ;;  %s721_s1 = inlined_call_operand.vmem [shape: f32[2,2,12,24], index: 1, kind: input, shape index: {}]   ;;  %s722_s2 = inlined_call_operand.vmem [shape: f32[2,24,16], index: 2, kind: input, shape index: {}]   ;;  %s723_s3 = inlined_call_operand.vmem [shape: f32[2,24,12], index: 3, kind: input, shape index: {}]   ;;  %s724_s4 = inlined_call_operand.vmem [shape: f32[2,24,16], index: 4, kind: output, shape index: {0}]   ;;  %s725_s5 = inlined_call_operand.vmem [shape: f32[2,24,12], index: 5, kind: output, shape index: {1}]  }
   0x1 LB: > { %s574_s19 = sadd.s32 4294967295, %s636_s18   ;;  %p578_p0 = scmp.ge.s32.totalorder %s636_s18, 1  ;;  %s636_s18 = sphi %s669_s18, %s16_s18  }
   0x2   : > { %p220_p1 = scmp.lt.s32.totalorder %s636_s18, 3 }
   0x4   : > { %p221_p2 = pnand %p578_p0, %p220_p1 }
   0x5   : > { %p268_p3 = scmp.lt.s32.totalorder (!%p221_p2), %s574_s19, 1 }
   0x6   : > { %224 = sbr.rel (%p221_p2) target bundleno = 320 (0x140), region = 36 }
   0xb   : > { %s727_s19 = smov (!%p268_p3, %s574_s19), 1  ;;  %vm302_vm0 = vcmask 195584   ;;  %vm387_vm1 = vcmask 97280   ;;  %v638_v24 = vmov 1.0   ;;  %vm437_vm2 = vcmask 130048  }
   0xc   : > { %s604_s20 = sshll.u32 %s727_s19, 5  ;;  %s608_s27 = smul.u32 24, %s727_s19 }
   0xd   : > { %s277_s23 = scalar_lea.vmem %s721_s1, %s604_s20  ;;  %s272_s26 = scalar_lea.vmem %s720_s0, %s604_s20 }
   0xe   : > { %v301_v0 = vld [vmem:[%s277_s23 + $0x8] sm:$0xf]  ;;  %v594_v1 = vld [vmem:[%s277_s23 + $0x18] sm:$0xf]  ;;  %v300_v2 = vld [vmem:[%s277_s23] sm:$0xff]  ;;  %s287_s30 = scalar_lea.vmem %s723_s3, %s608_s27  ;;  %s297_s8 = scalar_lea.vmem %s725_s5, %s608_s27 }
   0xf   : > { %587 = vmatpush.xpose.msk.msra.mxu0 %vm302_vm0, %v301_v0  ;;  %595 = vmatpush.xpose.msk.msra.mxu1 %vm302_vm0, %v594_v1  ;;  %v593_v3 = vld [vmem:[%s277_s23 + $0x10] sm:$0xff]  ;;  %v298_v4 = vld [vmem:[%s272_s26] sm:$0xff]  ;;  %v299_v6 = vld [vmem:[%s272_s26 + $0x8] sm:$0xff]  ;;  %s282_s11 = scalar_lea.vmem %s722_s2, %s608_s27  ;;  %s292_s14 = scalar_lea.vmem %s724_s4, %s608_s27 }
  0x10   : > { %606 = vmatpush.xpose.msk.msra.mxu3 %vm302_vm0, %v301_v0  ;;  %v591_v5 = vld [vmem:[%s272_s26 + $0x10] sm:$0xff]  ;;  %v592_v7 = vld [vmem:[%s272_s26 + $0x18] sm:$0xff]  ;;  %v441_v29 = vld [vmem:[%s287_s30] sm:$0xff] }
  0x11   : > { %v442_v30 = vld [vmem:[%s287_s30 + $0x8] sm:$0xff]  ;;  %v443_v31 = vld [vmem:[%s287_s30 + $0x10] sm:$0xff]  ;;  %v430_v39 = vld [vmem:[%s282_s11] sm:$0xff] }
  0x12   : > { %v431_v40 = vld [vmem:[%s282_s11 + $0x8] sm:$0xff]  ;;  %v432_v41 = vld [vmem:[%s282_s11 + $0x10] sm:$0xff] }
  0x13   : > { %588 = vmatpush.xpose.msk.msra.mxu0 %vm302_vm0, %v300_v2  ;;  %596 = vmatpush.xpose.msk.msra.mxu1 %vm302_vm0, %v593_v3 }
  0x14   : > { %607 = vmatpush.xpose.msk.msra.mxu3 %vm302_vm0, %v300_v2 }
  0x16   : > { %589 = vmatmul.msk.f32.vlgmr.msra.gmra.mxu0 %vm302_vm0, %v298_v4  ;;  %597 = vmatmul.msk.f32.vlgmr.msra.gmra.mxu1 %vm302_vm0, %v591_v5 }
  0x17   : > { %590 = vmatmul.msk.f32.vlgmr.msra.gmra.mxu3 %vm302_vm0, %v299_v6 }
  0x1e   : > { %598 = vmatmul.msk.f32.gmra.mxu1 %vm302_vm0, %v592_v7 }
  0x93   : > { %v377_v8 = vpop.f32.mrf.mxu1  ;;  %v332_v9 = vpop.f32.mrf.mxu0 }
  0x94   : > { %618 = vtanh.f32 %v332_v9 }
  0x95   : > { %620 = vtanh.f32 %v377_v8 }
  0x9a   : > { %v335_v10 = vpop.f32.mrf.mxu3  ;;  %v619_v12 = vpop.eup %618 }
  0x9b   : > { %622 = vtanh.f32 %v335_v10  ;;  %v380_v11 = vpop.f32.mrf.mxu1  ;;  %v621_v13 = vpop.eup %620 }
  0x9c   : > { %624 = vtanh.f32 %v380_v11  ;;  %v385_v15 = vadd.f32 %v621_v13, %v619_v12 }
  0x9e   : > { %v388_v19 = vsel %vm387_vm1, %v385_v15, 0.0 }
  0xa1   : > { %v623_v14 = vpop.eup %622 }
  0xa2   : > { %v625_v16 = vpop.eup %624 }
  0xa3   : > { %v386_v17 = vadd.f32 %v625_v16, %v623_v14 }
  0xa5   : > { %v389_v18 = vsel %vm387_vm1, %v386_v17, 0.0  ;;  %599 = vmatpush.xpose.msk.msra.mxu2 %vm387_vm1, %v386_v17 }
  0xa6   : > { %v390_v20 = vadd.f32 %v389_v18, %v388_v19 }
  0xa8   : > { %v391_v21 = vrot.slane %v390_v20, 4 }
  0xa9   : > { %600 = vmatpush.xpose.msk.msra.mxu2 %vm387_vm1, %v385_v15 }
  0xaa   : > { %v392_v22 = vadd.f32 %v391_v21, %v390_v20 }
  0xac   : > { %v393_v23 = vrot.slane %v392_v22, 2  ;;  %601 = vmatmul.msk.f32.vlgmr.msra.gmra.mxu2 %vm387_vm1, %v638_v24 }
  0xae   : > { %v394_v25 = vadd.f32 %v393_v23, %v392_v22 }
  0xb0   : > { %v395_v26 = vrot.slane %v394_v25, 1 }
  0xb2   : > { %v396_v27 = vadd.f32 %v395_v26, %v394_v25 }
  0xb4   : > { %v397_v28 = vmul.f32 0.5, %v396_v27 }
  0xb6   : > { %626 = vtanh.f32 %v397_v28 }
  0xbc   : > { %v627_v32 = vpop.eup %626 }
  0xbd   : > { %v444_v33 = vmul.f32 %v627_v32, %v441_v29  ;;  %v445_v34 = vmul.f32 %v627_v32, %v442_v30  ;;  %v446_v35 = vmul.f32 %v627_v32, %v443_v31 }
  0xbf   : > { %447 = vst.msk [vmem:[%s297_s8] sm:$0xff] %vm387_vm1, %v444_v33 }
  0xc0   : > { %448 = vst.msk [vmem:[%s297_s8 + $0x8] sm:$0xff] %vm387_vm1, %v445_v34 }
  0xc1   : > { %449 = vst.msk [vmem:[%s297_s8 + $0x10] sm:$0xff] %vm387_vm1, %v446_v35 }
 0x12f   : > { %v425_v36 = vpop.f32.mrf.mxu2 }
 0x130   : > { %v428_v37 = vmul.f32 0.5, %v425_v36 }
 0x132   : > { %628 = vtanh.f32 %v428_v37 }
 0x138   : > { %v629_v38 = vpop.eup %628 }
 0x139   : > { %v433_v42 = vperm.slane %v629_v38, 0 }
 0x13b   : > { %v434_v43 = vmul.f32 %v433_v42, %v430_v39  ;;  %v435_v44 = vmul.f32 %v433_v42, %v431_v40  ;;  %v436_v45 = vmul.f32 %v433_v42, %v432_v41 }
 0x13d   : > { %438 = vst.msk [vmem:[%s292_s14] sm:$0xff] %vm437_vm2, %v434_v43 }
 0x13e   : > { %439 = vst.msk [vmem:[%s292_s14 + $0x8] sm:$0xff] %vm437_vm2, %v435_v44 }
 0x13f   : > { %440 = vst.msk [vmem:[%s292_s14 + $0x10] sm:$0xff] %vm437_vm2, %v436_v45 }
 0x140 PF: > { %s16_s18 = sadd.s32 1, %s636_s18  }
 0x141   : > { %p13_p4 = scmp.ge.s32.totalorder %s16_s18, 4  }
 0x143   :  { %15 = sbr.rel (!%p13_p4) target bundleno = 1 (0x1), region = 89 }

// kernel: attention_forward.2
= control target key start
LH: loop header
LB: loop body
LE: loop exit
PB: predicated region body
PF: predicated region fallthrough
CT: control target
= control target key end

     0   :  { %s650_s24 = smov 0   ;;  %s701_s0 = inlined_call_operand.vmem [shape: f32[2,24,16], index: 0, kind: input, shape index: {}]   ;;  %s702_s1 = inlined_call_operand.vmem [shape: f32[2,24,12], index: 1, kind: input, shape index: {}]   ;;  %s703_s2 = inlined_call_operand.vmem [shape: f32[24,48], index: 2, kind: input, shape index: {}]   ;;  %s704_s3 = inlined_call_operand.vmem [shape: f32[1,48], index: 3, kind: input, shape index: {}]   ;;  %s705_s4 = inlined_call_operand.vmem [shape: f32[24,48], index: 4, kind: input, shape index: {}]   ;;  %s706_s5 = inlined_call_operand.vmem [shape: f32[1,48], index: 5, kind: input, shape index: {}]   ;;  %s707_s6 = inlined_call_operand.vmem [shape: f32[2,16,48], index: 6, kind: output, shape index: {0}]   ;;  %s708_s7 = inlined_call_operand.vmem [shape: f32[2,12,48], index: 7, kind: output, shape index: {1}]  }
   0x1 LB: > { %s565_s25 = sadd.s32 4294967295, %s608_s24   ;;  %p569_p0 = scmp.ge.s32.totalorder %s608_s24, 1  ;;  %s608_s24 = sphi %s650_s24, %s18_s24  }
   0x2   : > { %p250_p1 = scmp.lt.s32.totalorder %s608_s24, 3 }
   0x4   : > { %p251_p2 = pnand %p569_p0, %p250_p1 }
   0x5   : > { %p292_p3 = scmp.lt.s32.totalorder (!%p251_p2), %s565_s25, 1 }
   0x6   : > { %254 = sbr.rel (%p251_p2) target bundleno = 329 (0x149), region = 44 }
   0xb   : > { %v320_v0 = vld [vmem:[%s703_s2 + $0x10] sm:$0xff]  ;;  %v319_v2 = vld [vmem:[%s703_s2 + $0x8] sm:$0xff]  ;;  %v318_v4 = vld [vmem:[%s703_s2] sm:$0xff]  ;;  %s710_s25 = smov (!%p292_p3, %s565_s25), 1  ;;  %vm360_vm0 = vcmask 195584   ;;  %vm392_vm1 = vcmask 392192  }
   0xc   : > { %v323_v1 = vld [vmem:[%s705_s4 + $0x10] sm:$0xff]  ;;  %380 = vmatpush.msra.mxu0 %v320_v0  ;;  %v322_v3 = vld [vmem:[%s705_s4 + $0x8] sm:$0xff]  ;;  %v321_v5 = vld [vmem:[%s705_s4] sm:$0xff]  ;;  %584 = vmatpush.msra.mxu2 %v320_v0  ;;  %s590_s15 = smul.u32 24, %s710_s25  ;;  %s582_s28 = sshll.u32 %s710_s25, 4  ;;  %vm463_vm2 = vcmask 388096  }
   0xd   : > { %450 = vmatpush.msra.mxu1 %v323_v1  ;;  %587 = vmatpush.msra.mxu3 %v323_v1  ;;  %v600_v16 = vld [vmem:[%s704_s3] ss:$0 sm:$0xff]  ;;  %s306_s8 = scalar_lea.vmem %s707_s6, %s582_s28  ;;  %s311_s11 = scalar_lea.vmem %s708_s7, %s582_s28 }
   0xe   : > { %381 = vmatpush.msra.mxu0 %v319_v2  ;;  %585 = vmatpush.msra.mxu2 %v319_v2  ;;  %s301_s18 = scalar_lea.vmem %s702_s1, %s590_s15  ;;  %s296_s21 = scalar_lea.vmem %s701_s0, %s590_s15  ;;  %v601_v17 = vld [vmem:[%s706_s5] ss:$0 sm:$0xff] }
   0xf   : > { %451 = vmatpush.msra.mxu1 %v322_v3  ;;  %588 = vmatpush.msra.mxu3 %v322_v3  ;;  %v315_v6 = vld [vmem:[%s301_s18] sm:$0xff]  ;;  %v316_v8 = vld [vmem:[%s301_s18 + $0x8] sm:$0xff]  ;;  %v317_v10 = vld [vmem:[%s301_s18 + $0x10] sm:$0xff] }
  0x10   : > { %382 = vmatpush.msra.mxu0 %v318_v4  ;;  %586 = vmatpush.msra.mxu2 %v318_v4  ;;  %v312_v7 = vld [vmem:[%s296_s21] sm:$0xff]  ;;  %v313_v9 = vld [vmem:[%s296_s21 + $0x8] sm:$0xff]  ;;  %v314_v11 = vld [vmem:[%s296_s21 + $0x10] sm:$0xff] }
  0x11   : > { %452 = vmatpush.msra.mxu1 %v321_v5  ;;  %589 = vmatpush.msra.mxu3 %v321_v5 }
  0x12   : > { %399 = vxpose.xlu1.b32.start [1/3] (short) (narrow) %v315_v6, 16  ;;  %328 = vxpose.xlu0.b32.start [1/3] (short) (narrow) %v312_v7, 16 }
  0x1a   : > { %400 = vxpose.xlu1.b32.cont [2/3] (short) (narrow) %v316_v8, 16  ;;  %329 = vxpose.xlu0.b32.cont [2/3] (short) (narrow) %v313_v9, 16 }
  0x22   : > { %401 = vxpose.xlu1.b32.end [3/3] (short) (narrow) %v317_v10, 16  ;;  %330 = vxpose.xlu0.b32.end [3/3] (short) (narrow) %v314_v11, 16 }
  0xb6   : > { %v415_v12 = vpop.trf.xlu1  ;;  %v344_v13 = vpop.trf.xlu0 }
  0xb7   : > { %576 = vmatmul.msk.f32.vlgmr.msra.gmra.mxu0 %vm360_vm0, %v344_v13  ;;  %578 = vmatmul.msk.f32.vlgmr.msra.gmra.mxu1 %vm360_vm0, %v415_v12 }
  0xbe   : > { %v416_v14 = vpop.trf.xlu1  ;;  %v345_v15 = vpop.trf.xlu0 }
  0xbf   : > { %577 = vmatmul.msk.f32.vlgmr.msra.gmra.mxu2 %vm360_vm0, %v345_v15  ;;  %579 = vmatmul.msk.f32.vlgmr.msra.gmra.mxu3 %vm360_vm0, %v416_v14 }
 0x134   : > { %v384_v18 = vpop.f32.mrf.mxu0  ;;  %v454_v19 = vpop.f32.mrf.mxu1 }
 0x135   : > { %v385_v20 = vadd.f32 %v600_v16, %v384_v18  ;;  %v455_v21 = vadd.f32 %v601_v17, %v454_v19 }
 0x137   : > { %v390_v22 = vmax.f32 %v385_v20, 0.0  ;;  %v460_v23 = vmax.f32 %v455_v21, 0.0 }
 0x139   : > { %393 = vst.msk [vmem:[%s306_s8] sm:$0xff] %vm392_vm1, %v390_v22 }
 0x13a   : > { %462 = vst.msk [vmem:[%s311_s11] sm:$0xff] %vm392_vm1, %v460_v23 }
 0x142   : > { %v387_v24 = vpop.f32.mrf.mxu2  ;;  %v457_v25 = vpop.f32.mrf.mxu3 }
 0x143   : > { %v388_v26 = vadd.f32 %v600_v16, %v387_v24  ;;  %v458_v27 = vadd.f32 %v601_v17, %v457_v25 }
 0x145   : > { %v391_v28 = vmax.f32 %v388_v26, 0.0  ;;  %v461_v29 = vmax.f32 %v458_v27, 0.0 }
 0x147   : > { %394 = vst.msk [vmem:[%s306_s8 + $0x8] sm:$0xff] %vm392_vm1, %v391_v28 }
 0x148   : > { %464 = vst.msk [vmem:[%s311_s11 + $0x8] sm:$0xf] %vm463_vm2, %v461_v29 }
 0x149 PF: > { %s18_s24 = sadd.s32 1, %s608_s24  }
 0x14a   : > { %p15_p4 = scmp.ge.s32.totalorder %s18_s24, 4  }
 0x14c   :  { %17 = sbr.rel (!%p15_p4) target bundleno = 1 (0x1), region = 89 }

</bundles_post_ra>
